<compile_context>
chip_gen: v7x
topology: tpu7x:2x2x1
jax: 0.10.0
libtpu: 0.0.40
codegen_flags: <defaults>
</compile_context>

<pallas_src>
import jax
import jax.numpy as jnp
from jax.experimental import pallas as pl
from jax.experimental.pallas import tpu as pltpu


def _leaky_relu(x, negative_slope=0.2):
    return jnp.where(x > 0, x, negative_slope * x)


def generator_kernel(x_ref,
                     w1_ref, b1_ref,
                     w2_ref, b2_ref,
                     w3_ref, b3_ref,
                     w4_ref, b4_ref,
                     out_ref):
    """One batch tile of the fused forward pass.

    All four matmuls hit the MXU with f32 accumulation; the MXU operand dtype
    follows the weight dtype (bf16 on the fast path, f32 otherwise).
    leaky_relu / tanh run on the VPU/EUP in f32.  Dropout is identity (eval).
    """
    cdt = w1_ref.dtype  # compute dtype of MXU operands (f32 or bf16)

    h = x_ref[...]                                                    # f32
    h = jnp.dot(h.astype(cdt), w1_ref[...],
                preferred_element_type=jnp.float32) + b1_ref[...]
    h = _leaky_relu(h, 0.2)
    # dropout(p=0.3) -> identity in eval mode

    h = jnp.dot(h.astype(cdt), w2_ref[...],
                preferred_element_type=jnp.float32) + b2_ref[...]
    h = _leaky_relu(h, 0.2)
    # dropout(p=0.3) -> identity in eval mode

    h = jnp.dot(h.astype(cdt), w3_ref[...],
                preferred_element_type=jnp.float32) + b3_ref[...]
    h = _leaky_relu(h, 0.2)
    # dropout(p=0.3) -> identity in eval mode

    h = jnp.dot(h.astype(cdt), w4_ref[...],
                preferred_element_type=jnp.float32) + b4_ref[...]
    out_ref[...] = jnp.tanh(h)


def generator_forward(x, params, *, tile_b=128, use_bf16=False):
    """params = (w1, b1, w2, b2, w3, b3, w4, b4), weights already (in, out).

    Tiles the batch dimension (grid) with weights resident in VMEM.
    tile_b: rows of the batch tile.  For real GAN batches pick >=128 (v5e
    MXU edge) or >=256 (v6e/v7x).  If batch < tile_b, the whole (padded)
    batch is one tile.
    """
    batch, in_feat = x.shape
    w1, b1, w2, b2, w3, b3, w4, b4 = params
    h1, h2, h3, d_out = w1.shape[1], w2.shape[1], w3.shape[1], w4.shape[1]

    # Optionally store weights as bf16 (halves weight VMEM/HBM traffic and
    # feeds the bf16-native MXU on v6e/v7x).  Biases stay f32.
    if use_bf16:
        w1, w2, w3, w4 = (w.astype(jnp.bfloat16) for w in (w1, w2, w3, w4))
    params = (w1, b1, w2, b2, w3, b3, w4, b4)

    # Batch tile: multiple of 8 sublanes; pad batch to a multiple of the tile.
    if batch >= tile_b:
        tb = tile_b
    else:
        tb = ((batch + 7) // 8) * 8
    padded = pl.cdiv(batch, tb) * tb
    if padded != batch:
        x = jnp.pad(x, ((0, padded - batch), (0, 0)))
    grid = (padded // tb,)

    # x / out tiles stream over the batch grid; weights & biases always map to
    # block (0, 0) so they are fetched once and stay VMEM-resident.
    x_spec = pl.BlockSpec((tb, in_feat), lambda i: (i, 0))
    out_spec = pl.BlockSpec((tb, d_out), lambda i: (i, 0))

    def _resident(arr):
        return pl.BlockSpec(arr.shape, lambda i: (0, 0))

    param_specs = [_resident(p) for p in params]

    flops = 2 * padded * (in_feat * h1 + h1 * h2 + h2 * h3 + h3 * d_out)
    bytes_accessed = 4 * padded * (in_feat + d_out) + sum(
        p.size * p.dtype.itemsize for p in params)
    cost = pl.CostEstimate(flops=flops,
                           transcendentals=padded * d_out,
                           bytes_accessed=bytes_accessed)

    out = pl.pallas_call(
        generator_kernel,
        out_shape=jax.ShapeDtypeStruct((padded, d_out), jnp.float32),
        grid=grid,
        in_specs=[x_spec] + param_specs,
        out_specs=out_spec,
        compiler_params=pltpu.CompilerParams(
            # batch axis is embarrassingly parallel -> both TCs on v7x.
            dimension_semantics=("parallel",),
        ),
        cost_estimate=cost,
    )(x, *params)

    return out[:batch] if padded != batch else out


def init_generator_params(key, input_size, hidden_dim, output_size):
    """Deterministic PyTorch-style Linear init (uniform(-1/sqrt(fan_in), .)),
    but with weights stored transposed: (in_features, out_features)."""
    dims = [(input_size, hidden_dim),
            (hidden_dim, hidden_dim * 2),
            (hidden_dim * 2, hidden_dim * 4),
            (hidden_dim * 4, output_size)]
    params = []
    for (fan_in, fan_out) in dims:
        key, kw, kb = jax.random.split(key, 3)
        bound = 1.0 / jnp.sqrt(float(fan_in))
        w = jax.random.uniform(kw, (fan_in, fan_out), jnp.float32, -bound, bound)
        b = jax.random.uniform(kb, (1, fan_out), jnp.float32, -bound, bound)
        params += [w, b]
    return tuple(params)


def generator_reference(x, params):
    """Plain-JAX reference for correctness checking."""
    w1, b1, w2, b2, w3, b3, w4, b4 = params
    h = _leaky_relu(x @ w1 + b1, 0.2)
    h = _leaky_relu(h @ w2 + b2, 0.2)
    h = _leaky_relu(h @ w3 + b3, 0.2)
    return jnp.tanh(h @ w4 + b4)


if __name__ == "__main__":
    # Small shapes consistent with the module: Generator(input_size=16,
    # hidden_dim=32, output_size=128).  batch=200 exercises both the batch
    # grid (two 128-row tiles) and the pad/slice path.
    batch = 200
    input_size = 16
    hidden_dim = 32
    output_size = 128

    key = jax.random.PRNGKey(0)
    key, kx = jax.random.split(key)
    x = jax.random.normal(kx, (batch, input_size), jnp.float32)

    params = init_generator_params(key, input_size, hidden_dim, output_size)
    ref = generator_reference(x, params)

    # f32 MXU operands: bit-stable path, tight tolerance.
    out_f32 = jax.block_until_ready(generator_forward(x, params, tile_b=128,
                                                      use_bf16=False))
    assert out_f32.shape == (batch, output_size)
    assert jnp.allclose(out_f32, ref, atol=1e-5, rtol=1e-5), "f32 mismatch"

    # bf16 MXU operands (v6e/v7x fast path), f32 accumulation + f32 epilogue.
    out_bf16 = jax.block_until_ready(generator_forward(x, params, tile_b=128,
                                                       use_bf16=True))
    assert out_bf16.shape == (batch, output_size)
    assert jnp.allclose(out_bf16, ref, atol=5e-2, rtol=5e-2), "bf16 mismatch"

    print("KERNEL_OK")
</pallas_src>

<mosaic_0001>
module attributes {stable_mosaic.version = 11 : i64} {
  func.func @generator_kernel(%arg0: i32, %arg1: memref<128x16xf32, #tpu.memory_space<vmem>>, %arg2: memref<16x32xf32, #tpu.memory_space<vmem>>, %arg3: memref<1x32xf32, #tpu.memory_space<vmem>>, %arg4: memref<32x64xf32, #tpu.memory_space<vmem>>, %arg5: memref<1x64xf32, #tpu.memory_space<vmem>>, %arg6: memref<64x128xf32, #tpu.memory_space<vmem>>, %arg7: memref<1x128xf32, #tpu.memory_space<vmem>>, %arg8: memref<128x128xf32, #tpu.memory_space<vmem>>, %arg9: memref<1x128xf32, #tpu.memory_space<vmem>>, %arg10: memref<128x128xf32, #tpu.memory_space<vmem>>) attributes {dimension_semantics = [#tpu.dimension_semantics<parallel>], iteration_bounds = array<i64: 2>, scalar_prefetch = 0 : i64, scratch_operands = 0 : i64, tpu.core_type = #tpu.core_type<tc>, window_params = [{transform_indices = @transform_0, window_bounds = array<i64: 128, 16>}, {pipeline_mode = #tpu.pipeline_mode<synchronous>, transform_indices = @transform_1, window_bounds = array<i64: 16, 32>}, {pipeline_mode = #tpu.pipeline_mode<synchronous>, transform_indices = @transform_2, window_bounds = array<i64: 1, 32>}, {pipeline_mode = #tpu.pipeline_mode<synchronous>, transform_indices = @transform_3, window_bounds = array<i64: 32, 64>}, {pipeline_mode = #tpu.pipeline_mode<synchronous>, transform_indices = @transform_4, window_bounds = array<i64: 1, 64>}, {pipeline_mode = #tpu.pipeline_mode<synchronous>, transform_indices = @transform_5, window_bounds = array<i64: 64, 128>}, {pipeline_mode = #tpu.pipeline_mode<synchronous>, transform_indices = @transform_6, window_bounds = array<i64: 1, 128>}, {pipeline_mode = #tpu.pipeline_mode<synchronous>, transform_indices = @transform_7, window_bounds = array<i64: 128, 128>}, {pipeline_mode = #tpu.pipeline_mode<synchronous>, transform_indices = @transform_8, window_bounds = array<i64: 1, 128>}, {transform_indices = @transform_9, window_bounds = array<i64: 128, 128>}]} {
    %c0 = arith.constant 0 : index
    %c0_0 = arith.constant 0 : index
    %0 = vector.load %arg1[%c0, %c0_0] : memref<128x16xf32, #tpu.memory_space<vmem>>, vector<128x16xf32>
    %c0_1 = arith.constant 0 : index
    %c0_2 = arith.constant 0 : index
    %1 = vector.load %arg2[%c0_1, %c0_2] : memref<16x32xf32, #tpu.memory_space<vmem>>, vector<16x32xf32>
    %cst = arith.constant dense<0.000000e+00> : vector<128x32xf32>
    %2 = tpu.matmul %0, %1, %cst {dimension_numbers = #tpu.dot_dimension_numbers<[1], [0], [0], [1], [0, 0, 1, 1], [], []>} : vector<128x16xf32>, vector<16x32xf32>, vector<128x32xf32> -> vector<128x32xf32>
    %c0_3 = arith.constant 0 : index
    %c0_4 = arith.constant 0 : index
    %3 = vector.load %arg3[%c0_3, %c0_4] : memref<1x32xf32, #tpu.memory_space<vmem>>, vector<1x32xf32>
    %4 = vector.broadcast %3 : vector<1x32xf32> to vector<128x32xf32>
    %5 = arith.addf %2, %4 : vector<128x32xf32>
    %cst_5 = arith.constant 0.000000e+00 : f32
    %6 = vector.broadcast %cst_5 : f32 to vector<128x32xf32>
    %7 = arith.cmpf ogt, %5, %6 : vector<128x32xf32>
    %cst_6 = arith.constant 2.000000e-01 : f32
    %8 = vector.broadcast %cst_6 : f32 to vector<128x32xf32>
    %9 = arith.mulf %8, %5 : vector<128x32xf32>
    %10 = arith.select %7, %5, %9 : vector<128x32xi1>, vector<128x32xf32>
    %c0_7 = arith.constant 0 : index
    %c0_8 = arith.constant 0 : index
    %11 = vector.load %arg4[%c0_7, %c0_8] : memref<32x64xf32, #tpu.memory_space<vmem>>, vector<32x64xf32>
    %cst_9 = arith.constant dense<0.000000e+00> : vector<128x64xf32>
    %12 = tpu.matmul %10, %11, %cst_9 {dimension_numbers = #tpu.dot_dimension_numbers<[1], [0], [0], [1], [0, 0, 1, 1], [], []>} : vector<128x32xf32>, vector<32x64xf32>, vector<128x64xf32> -> vector<128x64xf32>
    %c0_10 = arith.constant 0 : index
    %c0_11 = arith.constant 0 : index
    %13 = vector.load %arg5[%c0_10, %c0_11] : memref<1x64xf32, #tpu.memory_space<vmem>>, vector<1x64xf32>
    %14 = vector.broadcast %13 : vector<1x64xf32> to vector<128x64xf32>
    %15 = arith.addf %12, %14 : vector<128x64xf32>
    %cst_12 = arith.constant 0.000000e+00 : f32
    %16 = vector.broadcast %cst_12 : f32 to vector<128x64xf32>
    %17 = arith.cmpf ogt, %15, %16 : vector<128x64xf32>
    %cst_13 = arith.constant 2.000000e-01 : f32
    %18 = vector.broadcast %cst_13 : f32 to vector<128x64xf32>
    %19 = arith.mulf %18, %15 : vector<128x64xf32>
    %20 = arith.select %17, %15, %19 : vector<128x64xi1>, vector<128x64xf32>
    %c0_14 = arith.constant 0 : index
    %c0_15 = arith.constant 0 : index
    %21 = vector.load %arg6[%c0_14, %c0_15] : memref<64x128xf32, #tpu.memory_space<vmem>>, vector<64x128xf32>
    %cst_16 = arith.constant dense<0.000000e+00> : vector<128x128xf32>
    %22 = tpu.matmul %20, %21, %cst_16 {dimension_numbers = #tpu.dot_dimension_numbers<[1], [0], [0], [1], [0, 0, 1, 1], [], []>} : vector<128x64xf32>, vector<64x128xf32>, vector<128x128xf32> -> vector<128x128xf32>
    %c0_17 = arith.constant 0 : index
    %c0_18 = arith.constant 0 : index
    %23 = vector.load %arg7[%c0_17, %c0_18] : memref<1x128xf32, #tpu.memory_space<vmem>>, vector<1x128xf32>
    %24 = vector.broadcast %23 : vector<1x128xf32> to vector<128x128xf32>
    %25 = arith.addf %22, %24 : vector<128x128xf32>
    %cst_19 = arith.constant 0.000000e+00 : f32
    %26 = vector.broadcast %cst_19 : f32 to vector<128x128xf32>
    %27 = arith.cmpf ogt, %25, %26 : vector<128x128xf32>
    %cst_20 = arith.constant 2.000000e-01 : f32
    %28 = vector.broadcast %cst_20 : f32 to vector<128x128xf32>
    %29 = arith.mulf %28, %25 : vector<128x128xf32>
    %30 = arith.select %27, %25, %29 : vector<128x128xi1>, vector<128x128xf32>
    %c0_21 = arith.constant 0 : index
    %c0_22 = arith.constant 0 : index
    %31 = vector.load %arg8[%c0_21, %c0_22] : memref<128x128xf32, #tpu.memory_space<vmem>>, vector<128x128xf32>
    %cst_23 = arith.constant dense<0.000000e+00> : vector<128x128xf32>
    %32 = tpu.matmul %30, %31, %cst_23 {dimension_numbers = #tpu.dot_dimension_numbers<[1], [0], [0], [1], [0, 0, 1, 1], [], []>} : vector<128x128xf32>, vector<128x128xf32>, vector<128x128xf32> -> vector<128x128xf32>
    %c0_24 = arith.constant 0 : index
    %c0_25 = arith.constant 0 : index
    %33 = vector.load %arg9[%c0_24, %c0_25] : memref<1x128xf32, #tpu.memory_space<vmem>>, vector<1x128xf32>
    %34 = vector.broadcast %33 : vector<1x128xf32> to vector<128x128xf32>
    %35 = arith.addf %32, %34 : vector<128x128xf32>
    %36 = math.tanh %35 : vector<128x128xf32>
    %c0_26 = arith.constant 0 : index
    %c0_27 = arith.constant 0 : index
    %37 = vector.load %arg10[%c0_26, %c0_27] : memref<128x128xf32, #tpu.memory_space<vmem>>, vector<128x128xf32>
    tpu.vector_store %arg10[%c0_26, %c0_27], %36 {strides = array<i32>} : memref<128x128xf32, #tpu.memory_space<vmem>>, vector<128x128xf32>,
    return
  }
  func.func @transform_0(%arg0: i32) -> (i32, i32) {
    %c0_i32 = arith.constant 0 : i32
    %c0_i32_0 = arith.constant 0 : i32
    return %arg0, %c0_i32 : i32, i32
  }
  func.func @transform_1(%arg0: i32) -> (i32, i32) {
    %c0_i32 = arith.constant 0 : i32
    %c0_i32_0 = arith.constant 0 : i32
    %c0_i32_1 = arith.constant 0 : i32
    return %c0_i32, %c0_i32_0 : i32, i32
  }
  func.func @transform_2(%arg0: i32) -> (i32, i32) {
    %c0_i32 = arith.constant 0 : i32
    %c0_i32_0 = arith.constant 0 : i32
    %c0_i32_1 = arith.constant 0 : i32
    return %c0_i32, %c0_i32_0 : i32, i32
  }
  func.func @transform_3(%arg0: i32) -> (i32, i32) {
    %c0_i32 = arith.constant 0 : i32
    %c0_i32_0 = arith.constant 0 : i32
    %c0_i32_1 = arith.constant 0 : i32
    return %c0_i32, %c0_i32_0 : i32, i32
  }
  func.func @transform_4(%arg0: i32) -> (i32, i32) {
    %c0_i32 = arith.constant 0 : i32
    %c0_i32_0 = arith.constant 0 : i32
    %c0_i32_1 = arith.constant 0 : i32
    return %c0_i32, %c0_i32_0 : i32, i32
  }
  func.func @transform_5(%arg0: i32) -> (i32, i32) {
    %c0_i32 = arith.constant 0 : i32
    %c0_i32_0 = arith.constant 0 : i32
    %c0_i32_1 = arith.constant 0 : i32
    return %c0_i32, %c0_i32_0 : i32, i32
  }
  func.func @transform_6(%arg0: i32) -> (i32, i32) {
    %c0_i32 = arith.constant 0 : i32
    %c0_i32_0 = arith.constant 0 : i32
    %c0_i32_1 = arith.constant 0 : i32
    return %c0_i32, %c0_i32_0 : i32, i32
  }
  func.func @transform_7(%arg0: i32) -> (i32, i32) {
    %c0_i32 = arith.constant 0 : i32
    %c0_i32_0 = arith.constant 0 : i32
    %c0_i32_1 = arith.constant 0 : i32
    return %c0_i32, %c0_i32_0 : i32, i32
  }
  func.func @transform_8(%arg0: i32) -> (i32, i32) {
    %c0_i32 = arith.constant 0 : i32
    %c0_i32_0 = arith.constant 0 : i32
    %c0_i32_1 = arith.constant 0 : i32
    return %c0_i32, %c0_i32_0 : i32, i32
  }
  func.func @transform_9(%arg0: i32) -> (i32, i32) {
    %c0_i32 = arith.constant 0 : i32
    %c0_i32_0 = arith.constant 0 : i32
    return %arg0, %c0_i32 : i32, i32
  }
}

</mosaic_0001>

<bundles_post_ra>
// kernel: tpu_custom_call.1
= control target key start
LH: loop header
LB: loop body
LE: loop exit
PB: predicated region body
PF: predicated region fallthrough
CT: control target
= control target key end

     0   :  { %14 = vsyncpa [#allocation3], 0  ;;  %s2317_s0 = inlined_call_operand.vmem [shape: f32[256,16], index: 0, kind: input, shape index: {}]   ;;  %s2318_s1 = inlined_call_operand.vmem [shape: f32[16,32], index: 1, kind: input, shape index: {}]   ;;  %s2319_s2 = inlined_call_operand.vmem [shape: f32[1,32], index: 2, kind: input, shape index: {}]   ;;  %s2320_s3 = inlined_call_operand.vmem [shape: f32[32,64], index: 3, kind: input, shape index: {}]   ;;  %s2321_s4 = inlined_call_operand.vmem [shape: f32[1,64], index: 4, kind: input, shape index: {}]   ;;  %s2322_s5 = inlined_call_operand.vmem [shape: f32[64,128], index: 5, kind: input, shape index: {}]   ;;  %s2323_s6 = inlined_call_operand.vmem [shape: f32[1,128], index: 6, kind: input, shape index: {}]   ;;  %s2324_s7 = inlined_call_operand.vmem [shape: f32[128,128], index: 7, kind: input, shape index: {}]   ;;  %s2325_s8 = inlined_call_operand.vmem [shape: f32[1,128], index: 8, kind: input, shape index: {}]   ;;  %s2326_s9 = inlined_call_operand.hbm [shape: f32[256,128], index: 9, kind: output, shape index: {}]  }
   0x1   :  { %16 = vsyncpa [#allocation3 + $0x1], 0  ;;  %s1952_s30 = smov 0   ;;  %s1954_s10 = smov 0  }
   0x2   :  { %s1956_s11 = smov 0   ;;  %s1958_s12 = smov 0  }
   0x3 LB: > { %s1973_s13 = sadd.s32 4294967295, %s1897_s12   ;;  %s1387_s14 = sadd.s32 4294967294, %s1897_s12   ;;  %s1897_s12 = sphi %s1958_s12, %s2332_s12   ;;  %s1893_s11 = sphi %s1956_s11, %s2331_s11   ;;  %s1889_s10 = sphi %s1954_s10, %s2330_s10   ;;  %s1885_s30 = sphi %s1952_s30, %s2329_s30  }
   0x4   : > { %s1977_s15 = sadd.s32 1, %s1897_s12   ;;  %s223_s16 = sadd.s32 1, %s1893_s11 }
   0x5   : > { %s220_s17 = ssub.s32 %s1897_s12, %s1977_s15  ;;  %p233_p0 = scmp.ne.s32.totalorder %s1893_s11, %s1889_s10 }
   0x6   : > { %p221_p1 = scmp.eq.s32.totalorder %s220_s17, 0  ;;  %p234_p2 = scmp.eq.s32.totalorder %s1973_s13, 1 }
   0x7   : > { %p239_p3 = scmp.ne.s32.totalorder %s1889_s10, %s1885_s30  ;;  %p240_p4 = scmp.eq.s32.totalorder %s1387_s14, 1 }
   0x8   : > { %s1988_s18 = scalar_select %p221_p1, %s1893_s11, %s223_s16  }
   0x9   : > { %p1990_p5 = por %p234_p2, %p233_p0  ;;  %p1994_p6 = por %p240_p4, %p239_p3 }
   0xa   : > { %p1390_p7 = scmp.ge.s32.totalorder %s1897_s12, 1  ;;  %p291_p8 = scmp.lt.s32.totalorder %s1897_s12, 3 }
   0xc   : > { %p292_p9 = pnand %p1390_p7, %p291_p8 }
   0xd   : > { %v350_v0 = vld [vmem:[%s2318_s1] sm:$0xff] (!%p292_p9)  ;;  %v351_v1 = vld [vmem:[%s2318_s1 + $0x8] sm:$0xff] (!%p292_p9)  ;;  %s1392_s25 = sshll.u32 (!%p292_p9), %s1973_s13, 4  ;;  %vm359_vm0 = vcmask (!%p292_p9), 130048   ;;  %v603_v22 = vld [vmem:[%s2320_s3 + $0x10] sm:$0xff] (!%p292_p9)  ;;  %vm612_vm3 = vcmask (!%p292_p9), 261120  }
   0xe   : > { %295 = sbr.rel (%p292_p9) target bundleno = 952 (0x3b8), region = 56  ;;  %v1702_v2 = vpack.c.bf16 (!%p292_p9), %v351_v1, %v350_v0  ;;  %p328_p10 = scmp.lt.s32.totalorder (!%p292_p9), %s1392_s25, 31  ;;  %v601_v19 = vld [vmem:[%s2320_s3] sm:$0xff] (!%p292_p9)  ;;  %v602_v20 = vld [vmem:[%s2320_s3 + $0x8] sm:$0xff] (!%p292_p9)  ;;  %v604_v23 = vld [vmem:[%s2320_s3 + $0x18] sm:$0xff] (!%p292_p9) }
   0xf   : > { %v1706_v21 = vpack.c.bf16 (!%p292_p9), %v602_v20, %v601_v19  ;;  %v1710_v24 = vpack.c.bf16 (!%p292_p9), %v604_v23, %v603_v22  ;;  %v854_v25 = vld [vmem:[%s2322_s5] sm:$0xff] (!%p292_p9)  ;;  %v855_v26 = vld [vmem:[%s2322_s5 + $0x8] sm:$0xff] (!%p292_p9)  ;;  %v856_v27 = vld [vmem:[%s2322_s5 + $0x10] sm:$0xff] (!%p292_p9)  ;;  %s324_s22 = sand.u32 (!%p292_p9), 1, %s1889_s10   ;;  %s1899_s16 = smov (!%p292_p9), [#allocation2]  }
  0x10   : > { %1703 = vmatprep.subr.bf16.mxu0 (!%p292_p9), %v1702_v2  ;;  %v1714_v28 = vpack.c.bf16 (!%p292_p9), %v855_v26, %v854_v25  ;;  %v857_v29 = vld [vmem:[%s2322_s5 + $0x18] sm:$0xff] (!%p292_p9)  ;;  %v858_v31 = vld [vmem:[%s2322_s5 + $0x20] sm:$0xff] (!%p292_p9)  ;;  %v859_v32 = vld [vmem:[%s2322_s5 + $0x28] sm:$0xff] (!%p292_p9)  ;;  %s1391_s23 = sshll.u32 (!%p292_p9), %s324_s22, 7  ;;  %s1839_s17 = sshll.u32 (!%p292_p9), %s1899_s16, 4  ;;  %s1840_s17 = int_to_ptr.vmem [resolvable:$false] %s1839_s17 }
  0x11   : > { %1705 = vmatpush3.bf16.msra.mxu0 (!%p292_p9), %v1702_v2  ;;  %1707 = vmatprep.subr.bf16.mxu1 (!%p292_p9), %v1706_v21  ;;  %v1718_v30 = vpack.c.bf16 (!%p292_p9), %v857_v29, %v856_v27  ;;  %v1722_v33 = vpack.c.bf16 (!%p292_p9), %v859_v32, %v858_v31  ;;  %v860_v34 = vld [vmem:[%s2322_s5 + $0x30] sm:$0xff] (!%p292_p9)  ;;  %v861_v35 = vld [vmem:[%s2322_s5 + $0x38] sm:$0xff] (!%p292_p9)  ;;  %v2083_v37 = vld [vmem:[%s2319_s2] ss:$0 sm:$0xff] (!%p292_p9)  ;;  %s2238_s24 = scalar_lea.vmem (!%p292_p9), [#allocation2], %s1391_s23  ;;  %s1841_s21 = scalar_lea.vmem (!%p292_p9), %s1840_s17, 4096 }
  0x12   : > { %1709 = vmatpush3.bf16.msra.mxu1 (!%p292_p9), %v1706_v21  ;;  %1715 = vmatprep.subr.bf16.mxu0 (!%p292_p9), %v1714_v28  ;;  %v1726_v36 = vpack.c.bf16 (!%p292_p9), %v861_v35, %v860_v34 }
  0x13   : > { %1711 = vmatprep.subr.bf16.mxu1 (!%p292_p9), %v1710_v24 }
  0x15   : > { %s2334_s25 = smov (!%p328_p10, %s1392_s25), 31 }
  0x16   : > { %s1393_s26 = sshll.u32 %s2334_s25, 3  ;;  %1713 = vmatpush3.bf16.msra.mxu1 %v1710_v24  ;;  %s1451_s25 = sshll.u32 %s1973_s13, 11 }
  0x17   : > { %s2010_s29 = scalar_lea.vmem %s2317_s0, %s1393_s26  ;;  %s1325_s26 = sshll.u32 %s2238_s24, 4  ;;  %s2270_s26 = int_to_ptr.vmem [resolvable:$true] %s1325_s26 }
  0x18   : > { %v334_v3 = vld [vmem:[%s2010_s29] sm:$0xff]  ;;  %v335_v4 = vld [vmem:[%s2010_s29 + $0x8] sm:$0xff]  ;;  %v336_v5 = vld [vmem:[%s2010_s29 + $0x10] sm:$0xff]  ;;  %s2276_s13 = scalar_lea.sflag [#allocation3], %s324_s22  ;;  %s1835_s14 = scalar_lea.vmem %s2270_s26, 2048 }
  0x19   : > { %1550 = vmatprep.mubr.msk.f32.mxu0 %vm359_vm0, %v334_v3  ;;  %v337_v6 = vld [vmem:[%s2010_s29 + $0x18] sm:$0xff]  ;;  %v338_v7 = vld [vmem:[%s2010_s29 + $0x20] sm:$0xff]  ;;  %v339_v8 = vld [vmem:[%s2010_s29 + $0x28] sm:$0xff]  ;;  %p1836_p11 = scmp.ne.s32.totalorder %s2270_s26, %s1835_s14  ;;  %p1842_p0 = scmp.lt.s32.totalorder %s2270_s26, %s1840_s17 }
  0x1a   : > { %1551 = vmatmul.mubr.msk.f32.vlgmr.msra.gmra.mrb[0].mxu0 %vm359_vm0, %v335_v4  ;;  %v340_v9 = vld [vmem:[%s2010_s29 + $0x30] sm:$0xff]  ;;  %v341_v10 = vld [vmem:[%s2010_s29 + $0x38] sm:$0xff]  ;;  %v342_v11 = vld [vmem:[%s2010_s29 + $0x40] sm:$0xff]  ;;  %p1843_p1 = scmp.lt.s32.totalorder %s1841_s21, %s1835_s14 }
  0x1b   : > { %1553 = vmatprep.mubr.msk.f32.mxu0 %vm359_vm0, %v336_v5  ;;  %v343_v12 = vld [vmem:[%s2010_s29 + $0x48] sm:$0xff]  ;;  %v344_v13 = vld [vmem:[%s2010_s29 + $0x50] sm:$0xff]  ;;  %v345_v14 = vld [vmem:[%s2010_s29 + $0x58] sm:$0xff]  ;;  %1717 = vmatpush3.bf16.msra.mxu0 %v1714_v28  ;;  %p1837_p12 = pnand %p1836_p11, %p1990_p5 }
  0x1c   : > { %v346_v15 = vld [vmem:[%s2010_s29 + $0x60] sm:$0xff]  ;;  %v347_v16 = vld [vmem:[%s2010_s29 + $0x68] sm:$0xff]  ;;  %v348_v17 = vld [vmem:[%s2010_s29 + $0x70] sm:$0xff]  ;;  %1719 = vmatprep.subr.bf16.mxu0 %v1718_v30  ;;  %p1844_p2 = por %p1843_p1, %p1842_p0 }
  0x1d   : > { %v349_v18 = vld [vmem:[%s2010_s29 + $0x78] sm:$0xff]  ;;  %s2268_s29 = scalar_lea.hbm %s2326_s9, %s1451_s25  ;;  %p1838_p13 = pneg %p1837_p12 }
  0x1e   : > { %1554 = vmatmul.mubr.msk.f32.gmra.mrb[2].mxu0 %vm359_vm0, %v337_v6 }
  0x1f   : > { %1556 = vmatprep.mubr.msk.f32.mxu0 %vm359_vm0, %v338_v7  ;;  %1721 = vmatpush3.bf16.msra.mxu0 %v1718_v30  ;;  %p1845_p3 = pnand %p1844_p2, %p1838_p13 }
  0x20   : > { %1723 = vmatprep.subr.bf16.mxu0 %v1722_v33 }
  0x22   : > { %1557 = vmatmul.mubr.msk.f32.gmra.mrb[4].mxu0 %vm359_vm0, %v339_v8 }
  0x23   : > { %1559 = vmatprep.mubr.msk.f32.mxu0 %vm359_vm0, %v340_v9  ;;  %1725 = vmatpush3.bf16.msra.mxu0 %v1722_v33 }
  0x24   : > { %1727 = vmatprep.subr.bf16.mxu0 %v1726_v36 }
  0x26   : > { %1560 = vmatmul.mubr.msk.f32.gmra.mrb[6].mxu0 %vm359_vm0, %v341_v10 }
  0x27   : > { %1562 = vmatprep.mubr.msk.f32.mxu0 %vm359_vm0, %v342_v11  ;;  %1729 = vmatpush3.bf16.msra.mxu0 %v1726_v36 }
  0x2a   : > { %1563 = vmatmul.mubr.msk.f32.gmra.mrb[8].mxu0 %vm359_vm0, %v343_v12 }
  0x2b   : > { %1565 = vmatprep.mubr.msk.f32.mxu0 %vm359_vm0, %v344_v13 }
  0x2e   : > { %1566 = vmatmul.mubr.msk.f32.gmra.mrb[10].mxu0 %vm359_vm0, %v345_v14 }
  0x2f   : > { %1568 = vmatprep.mubr.msk.f32.mxu0 %vm359_vm0, %v346_v15 }
  0x32   : > { %1569 = vmatmul.mubr.msk.f32.gmra.mrb[12].mxu0 %vm359_vm0, %v347_v16 }
  0x33   : > { %1571 = vmatprep.mubr.msk.f32.mxu0 %vm359_vm0, %v348_v17 }
  0x36   : > { %1572 = vmatmul.mubr.msk.f32.gmra.mrb[14].mxu0 %vm359_vm0, %v349_v18 }
  0xed   : > { %v1552_v38 = vpop.f32.mrb[0].mxu0 }
  0xee   : > { %v480_v39 = vadd.f32 %v1552_v38, %v2083_v37  ;;  %v474_v40 = vpop.f32.mrb[1].mxu0 }
  0xef   : > { %v475_v41 = vadd.f32 %v2083_v37, %v474_v40  ;;  %v1113_v40 = vld [vmem:[%s2324_s7 + $0x10] sm:$0xff] }
  0xf0   : > { %v570_v42 = vmul.f32 0.2, %v480_v39  ;;  %vm554_vm1 = vcmp.gt.f32.partialorder %v480_v39, 0.0 }
  0xf1   : > { %v1555_v43 = vpop.f32.mrb[2].mxu0  ;;  %vm553_vm2 = vcmp.gt.f32.partialorder %v475_v41, 0.0  ;;  %v569_v44 = vmul.f32 0.2, %v475_v41 }
  0xf2   : > { %v490_v45 = vadd.f32 %v1555_v43, %v2083_v37  ;;  %v484_v46 = vpop.f32.mrb[3].mxu0  ;;  %v586_v50 = vsel %vm554_vm1, %v480_v39, %v570_v42  ;;  %v1112_v39 = vld [vmem:[%s2324_s7 + $0x8] sm:$0xff]  ;;  %v1114_v42 = vld [vmem:[%s2324_s7 + $0x18] sm:$0xff] }
  0xf3   : > { %v485_v47 = vadd.f32 %v2083_v37, %v484_v46  ;;  %v585_v48 = vsel %vm553_vm2, %v475_v41, %v569_v44  ;;  %v1734_v43 = vpack.c.bf16 %v1114_v42, %v1113_v40  ;;  %v1115_v44 = vld [vmem:[%s2324_s7 + $0x20] sm:$0xff] }
  0xf4   : > { %v572_v49 = vmul.f32 0.2, %v490_v45  ;;  %1582 = vmatprep.mubr.msk.f32.mxu1 %vm612_vm3, %v585_v48  ;;  %vm556_vm4 = vcmp.gt.f32.partialorder %v490_v45, 0.0  ;;  %v1118_v48 = vld [vmem:[%s2324_s7 + $0x38] sm:$0xff] }
  0xf5   : > { %vm555_vm5 = vcmp.gt.f32.partialorder %v485_v47, 0.0  ;;  %v571_v51 = vmul.f32 0.2, %v485_v47  ;;  %v1558_v52 = vpop.f32.mrb[4].mxu0  ;;  %1583 = vmatmul.mubr.msk.f32.vlgmr.msra.gmra.mrb[0].mxu1 %vm612_vm3, %v586_v50  ;;  %v1119_v50 = vld [vmem:[%s2324_s7 + $0x40] sm:$0xff] }
  0xf6   : > { %v500_v53 = vadd.f32 %v1558_v52, %v2083_v37  ;;  %v494_v54 = vpop.f32.mrb[5].mxu0  ;;  %v588_v58 = vsel %vm556_vm4, %v490_v45, %v572_v49  ;;  %v1116_v45 = vld [vmem:[%s2324_s7 + $0x28] sm:$0xff]  ;;  %vm869_vm4 = vcmask 523264  }
  0xf7   : > { %v495_v55 = vadd.f32 %v2083_v37, %v494_v54  ;;  %v587_v56 = vsel %vm555_vm5, %v485_v47, %v571_v51  ;;  %v1738_v46 = vpack.c.bf16 %v1116_v45, %v1115_v44  ;;  %v1117_v47 = vld [vmem:[%s2324_s7 + $0x30] sm:$0xff]  ;;  %v1120_v51 = vld [vmem:[%s2324_s7 + $0x48] sm:$0xff]  ;;  %v1122_v54 = vld [vmem:[%s2324_s7 + $0x58] sm:$0xff] }
  0xf8   : > { %v574_v57 = vmul.f32 0.2, %v500_v53  ;;  %1585 = vmatprep.mubr.msk.f32.mxu1 %vm612_vm3, %v587_v56  ;;  %vm558_vm6 = vcmp.gt.f32.partialorder %v500_v53, 0.0  ;;  %v1742_v49 = vpack.c.bf16 %v1118_v48, %v1117_v47  ;;  %v1746_v52 = vpack.c.bf16 %v1120_v51, %v1119_v50  ;;  %v1123_v56 = vld [vmem:[%s2324_s7 + $0x60] sm:$0xff] }
  0xf9   : > { %vm557_vm7 = vcmp.gt.f32.partialorder %v495_v55, 0.0  ;;  %v573_v59 = vmul.f32 0.2, %v495_v55  ;;  %v1561_v60 = vpop.f32.mrb[6].mxu0  ;;  %1586 = vmatmul.mubr.msk.f32.gmra.mrb[2].mxu1 %vm612_vm3, %v588_v58 }
  0xfa   : > { %v510_v61 = vadd.f32 %v1561_v60, %v2083_v37  ;;  %v504_v62 = vpop.f32.mrb[7].mxu0  ;;  %v590_v2 = vsel %vm558_vm6, %v500_v53, %v574_v57  ;;  %v1121_v53 = vld [vmem:[%s2324_s7 + $0x50] sm:$0xff]  ;;  %v1124_v57 = vld [vmem:[%s2324_s7 + $0x68] sm:$0xff] }
  0xfb   : > { %v505_v63 = vadd.f32 %v2083_v37, %v504_v62  ;;  %v589_v0 = vsel %vm557_vm7, %v495_v55, %v573_v59  ;;  %v1750_v55 = vpack.c.bf16 %v1122_v54, %v1121_v53  ;;  %v1754_v58 = vpack.c.bf16 %v1124_v57, %v1123_v56  ;;  %v2162_v59 = vld [vmem:[%s2321_s4] ss:$0 sm:$0xff] }
  0xfc   : > { %v576_v1 = vmul.f32 0.2, %v510_v61  ;;  %1588 = vmatprep.mubr.msk.f32.mxu1 %vm612_vm3, %v589_v0  ;;  %vm560_vm8 = vcmp.gt.f32.partialorder %v510_v61, 0.0 }
  0xfd   : > { %vm559_vm9 = vcmp.gt.f32.partialorder %v505_v63, 0.0  ;;  %v575_v3 = vmul.f32 0.2, %v505_v63  ;;  %v1564_v4 = vpop.f32.mrb[8].mxu0  ;;  %1589 = vmatmul.mubr.msk.f32.gmra.mrb[4].mxu1 %vm612_vm3, %v590_v2 }
  0xfe   : > { %v520_v5 = vadd.f32 %v1564_v4, %v2083_v37  ;;  %v514_v6 = vpop.f32.mrb[9].mxu0  ;;  %v592_v10 = vsel %vm560_vm8, %v510_v61, %v576_v1 }
  0xff   : > { %v515_v7 = vadd.f32 %v2083_v37, %v514_v6  ;;  %v591_v8 = vsel %vm559_vm9, %v505_v63, %v575_v3 }
 0x100   : > { %v578_v9 = vmul.f32 0.2, %v520_v5  ;;  %1591 = vmatprep.mubr.msk.f32.mxu1 %vm612_vm3, %v591_v8  ;;  %vm562_vm10 = vcmp.gt.f32.partialorder %v520_v5, 0.0 }
 0x101   : > { %vm561_vm11 = vcmp.gt.f32.partialorder %v515_v7, 0.0  ;;  %v577_v11 = vmul.f32 0.2, %v515_v7  ;;  %v1567_v12 = vpop.f32.mrb[10].mxu0  ;;  %1592 = vmatmul.mubr.msk.f32.gmra.mrb[6].mxu1 %vm612_vm3, %v592_v10 }
 0x102   : > { %v530_v13 = vadd.f32 %v1567_v12, %v2083_v37  ;;  %v524_v14 = vpop.f32.mrb[11].mxu0  ;;  %v594_v18 = vsel %vm562_vm10, %v520_v5, %v578_v9 }
 0x103   : > { %v525_v15 = vadd.f32 %v2083_v37, %v524_v14  ;;  %v593_v16 = vsel %vm561_vm11, %v515_v7, %v577_v11 }
 0x104   : > { %v580_v17 = vmul.f32 0.2, %v530_v13  ;;  %1594 = vmatprep.mubr.msk.f32.mxu1 %vm612_vm3, %v593_v16  ;;  %vm564_vm12 = vcmp.gt.f32.partialorder %v530_v13, 0.0 }
 0x105   : > { %vm563_vm13 = vcmp.gt.f32.partialorder %v525_v15, 0.0  ;;  %v579_v19 = vmul.f32 0.2, %v525_v15  ;;  %v1570_v20 = vpop.f32.mrb[12].mxu0  ;;  %1595 = vmatmul.mubr.msk.f32.gmra.mrb[8].mxu1 %vm612_vm3, %v594_v18 }
 0x106   : > { %v540_v21 = vadd.f32 %v1570_v20, %v2083_v37  ;;  %v534_v22 = vpop.f32.mrb[13].mxu0  ;;  %v596_v26 = vsel %vm564_vm12, %v530_v13, %v580_v17 }
 0x107   : > { %v535_v23 = vadd.f32 %v2083_v37, %v534_v22  ;;  %v595_v24 = vsel %vm563_vm13, %v525_v15, %v579_v19 }
 0x108   : > { %v582_v25 = vmul.f32 0.2, %v540_v21  ;;  %1597 = vmatprep.mubr.msk.f32.mxu1 %vm612_vm3, %v595_v24  ;;  %vm566_vm14 = vcmp.gt.f32.partialorder %v540_v21, 0.0 }
 0x109   : > { %vm565_vm15 = vcmp.gt.f32.partialorder %v535_v23, 0.0  ;;  %v581_v27 = vmul.f32 0.2, %v535_v23  ;;  %v1573_v28 = vpop.f32.mrb[14].mxu0  ;;  %1598 = vmatmul.mubr.msk.f32.gmra.mrb[10].mxu1 %vm612_vm3, %v596_v26 }
 0x10a   : > { %v550_v29 = vadd.f32 %v1573_v28, %v2083_v37  ;;  %v544_v30 = vpop.f32.mrb[15].mxu0  ;;  %v598_v34 = vsel %vm566_vm14, %v540_v21, %v582_v25 }
 0x10b   : > { %v545_v31 = vadd.f32 %v2083_v37, %v544_v30  ;;  %v597_v32 = vsel %vm565_vm15, %v535_v23, %v581_v27  ;;  %v1111_v37 = vld [vmem:[%s2324_s7] sm:$0xff] }
 0x10c   : > { %v584_v33 = vmul.f32 0.2, %v550_v29  ;;  %1600 = vmatprep.mubr.msk.f32.mxu1 %vm612_vm3, %v597_v32  ;;  %vm568_vm0 = vcmp.gt.f32.partialorder %v550_v29, 0.0  ;;  %v1730_v41 = vpack.c.bf16 %v1112_v39, %v1111_v37 }
 0x10d   : > { %vm567_vm1 = vcmp.gt.f32.partialorder %v545_v31, 0.0  ;;  %v583_v35 = vmul.f32 0.2, %v545_v31  ;;  %1601 = vmatmul.mubr.msk.f32.gmra.mrb[12].mxu1 %vm612_vm3, %v598_v34 }
 0x10e   : > { %v600_v38 = vsel %vm568_vm0, %v550_v29, %v584_v33  ;;  %1731 = vmatprep.subr.bf16.mxu1 %v1730_v41 }
 0x10f   : > { %v599_v36 = vsel %vm567_vm1, %v545_v31, %v583_v35  ;;  %1733 = vmatpush3.bf16.msra.mxu1 %v1730_v41 }
 0x110   : > { %1603 = vmatprep.mubr.msk.f32.mxu1 %vm612_vm3, %v599_v36  ;;  %1735 = vmatprep.subr.bf16.mxu1 %v1734_v43 }
 0x111   : > { %1604 = vmatmul.mubr.msk.f32.gmra.mrb[14].mxu1 %vm612_vm3, %v600_v38 }
 0x113   : > { %1737 = vmatpush3.bf16.msra.mxu1 %v1734_v43 }
 0x114   : > { %1739 = vmatprep.subr.bf16.mxu1 %v1738_v46 }
 0x117   : > { %1741 = vmatpush3.bf16.msra.mxu1 %v1738_v46 }
 0x118   : > { %1743 = vmatprep.subr.bf16.mxu1 %v1742_v49 }
 0x11b   : > { %1745 = vmatpush3.bf16.msra.mxu1 %v1742_v49 }
 0x11c   : > { %1747 = vmatprep.subr.bf16.mxu1 %v1746_v52 }
 0x11f   : > { %1749 = vmatpush3.bf16.msra.mxu1 %v1746_v52 }
 0x120   : > { %1751 = vmatprep.subr.bf16.mxu1 %v1750_v55 }
 0x123   : > { %1753 = vmatpush3.bf16.msra.mxu1 %v1750_v55 }
 0x124   : > { %1755 = vmatprep.subr.bf16.mxu1 %v1754_v58 }
 0x127   : > { %1757 = vmatpush3.bf16.msra.mxu1 %v1754_v58 }
 0x1c8   : > { %v1584_v60 = vpop.f32.mrb[0].mxu1 }
 0x1c9   : > { %v733_v61 = vadd.f32 %v1584_v60, %v2162_v59  ;;  %v727_v62 = vpop.f32.mrb[1].mxu1 }
 0x1ca   : > { %v728_v63 = vadd.f32 %v2162_v59, %v727_v62 }
 0x1cb   : > { %v823_v0 = vmul.f32 0.2, %v733_v61  ;;  %vm807_vm2 = vcmp.gt.f32.partialorder %v733_v61, 0.0 }
 0x1cc   : > { %vm806_vm3 = vcmp.gt.f32.partialorder %v728_v63, 0.0  ;;  %v822_v1 = vmul.f32 0.2, %v728_v63  ;;  %v1587_v2 = vpop.f32.mrb[2].mxu1 }
 0x1cd   : > { %v743_v3 = vadd.f32 %v1587_v2, %v2162_v59  ;;  %v737_v4 = vpop.f32.mrb[3].mxu1  ;;  %v839_v7 = vsel %vm807_vm2, %v733_v61, %v823_v0  ;;  %v1126_v61 = vld [vmem:[%s2324_s7 + $0x78] sm:$0xff] }
 0x1ce   : > { %v738_v5 = vadd.f32 %v2162_v59, %v737_v4  ;;  %v838_v6 = vsel %vm806_vm3, %v728_v63, %v822_v1  ;;  %v2205_v63 = vld [vmem:[%s2323_s6] ss:$0 sm:$0xff] }
 0x1cf   : > { %v825_v8 = vmul.f32 0.2, %v743_v3  ;;  %1622 = vmatprep.mubr.msk.f32.mxu0 %vm869_vm4, %v838_v6  ;;  %vm809_vm5 = vcmp.gt.f32.partialorder %v743_v3, 0.0 }
 0x1d0   : > { %vm808_vm6 = vcmp.gt.f32.partialorder %v738_v5, 0.0  ;;  %v824_v9 = vmul.f32 0.2, %v738_v5  ;;  %v1590_v10 = vpop.f32.mrb[4].mxu1  ;;  %1623 = vmatmul.mubr.msk.f32.vlgmr.msra.gmra.mrb[16].mxu0 %vm869_vm4, %v839_v7 }
 0x1d1   : > { %v753_v11 = vadd.f32 %v1590_v10, %v2162_v59  ;;  %v747_v12 = vpop.f32.mrb[5].mxu1  ;;  %v841_v16 = vsel %vm809_vm5, %v743_v3, %v825_v8 }
 0x1d2   : > { %v748_v13 = vadd.f32 %v2162_v59, %v747_v12  ;;  %v840_v14 = vsel %vm808_vm6, %v738_v5, %v824_v9 }
 0x1d3   : > { %v827_v15 = vmul.f32 0.2, %v753_v11  ;;  %1625 = vmatprep.mubr.msk.f32.mxu0 %vm869_vm4, %v840_v14  ;;  %vm811_vm7 = vcmp.gt.f32.partialorder %v753_v11, 0.0 }
 0x1d4   : > { %vm810_vm8 = vcmp.gt.f32.partialorder %v748_v13, 0.0  ;;  %v826_v17 = vmul.f32 0.2, %v748_v13  ;;  %v1593_v18 = vpop.f32.mrb[6].mxu1  ;;  %1626 = vmatmul.mubr.msk.f32.gmra.mrb[18].mxu0 %vm869_vm4, %v841_v16 }
 0x1d5   : > { %v763_v19 = vadd.f32 %v1593_v18, %v2162_v59  ;;  %v757_v20 = vpop.f32.mrb[7].mxu1  ;;  %v843_v24 = vsel %vm811_vm7, %v753_v11, %v827_v15 }
 0x1d6   : > { %v758_v21 = vadd.f32 %v2162_v59, %v757_v20  ;;  %v842_v22 = vsel %vm810_vm8, %v748_v13, %v826_v17 }
 0x1d7   : > { %v829_v23 = vmul.f32 0.2, %v763_v19  ;;  %1628 = vmatprep.mubr.msk.f32.mxu0 %vm869_vm4, %v842_v22  ;;  %vm813_vm9 = vcmp.gt.f32.partialorder %v763_v19, 0.0 }
 0x1d8   : > { %vm812_vm10 = vcmp.gt.f32.partialorder %v758_v21, 0.0  ;;  %v828_v25 = vmul.f32 0.2, %v758_v21  ;;  %v1596_v26 = vpop.f32.mrb[8].mxu1  ;;  %1629 = vmatmul.mubr.msk.f32.gmra.mrb[20].mxu0 %vm869_vm4, %v843_v24 }
 0x1d9   : > { %v773_v27 = vadd.f32 %v1596_v26, %v2162_v59  ;;  %v767_v28 = vpop.f32.mrb[9].mxu1  ;;  %v845_v32 = vsel %vm813_vm9, %v763_v19, %v829_v23 }
 0x1da   : > { %v768_v29 = vadd.f32 %v2162_v59, %v767_v28  ;;  %v844_v30 = vsel %vm812_vm10, %v758_v21, %v828_v25 }
 0x1db   : > { %v831_v31 = vmul.f32 0.2, %v773_v27  ;;  %1631 = vmatprep.mubr.msk.f32.mxu0 %vm869_vm4, %v844_v30  ;;  %vm815_vm11 = vcmp.gt.f32.partialorder %v773_v27, 0.0 }
 0x1dc   : > { %vm814_vm12 = vcmp.gt.f32.partialorder %v768_v29, 0.0  ;;  %v830_v33 = vmul.f32 0.2, %v768_v29  ;;  %v1599_v34 = vpop.f32.mrb[10].mxu1  ;;  %1632 = vmatmul.mubr.msk.f32.gmra.mrb[22].mxu0 %vm869_vm4, %v845_v32 }
 0x1dd   : > { %v783_v35 = vadd.f32 %v1599_v34, %v2162_v59  ;;  %v777_v36 = vpop.f32.mrb[11].mxu1  ;;  %v847_v40 = vsel %vm815_vm11, %v773_v27, %v831_v31 }
 0x1de   : > { %v778_v38 = vadd.f32 %v2162_v59, %v777_v36  ;;  %v846_v37 = vsel %vm814_vm12, %v768_v29, %v830_v33 }
 0x1df   : > { %v833_v39 = vmul.f32 0.2, %v783_v35  ;;  %1634 = vmatprep.mubr.msk.f32.mxu0 %vm869_vm4, %v846_v37  ;;  %vm817_vm13 = vcmp.gt.f32.partialorder %v783_v35, 0.0 }
 0x1e0   : > { %vm816_vm14 = vcmp.gt.f32.partialorder %v778_v38, 0.0  ;;  %v832_v41 = vmul.f32 0.2, %v778_v38  ;;  %v1602_v42 = vpop.f32.mrb[12].mxu1  ;;  %1635 = vmatmul.mubr.msk.f32.gmra.mrb[24].mxu0 %vm869_vm4, %v847_v40 }
 0x1e1   : > { %v793_v43 = vadd.f32 %v1602_v42, %v2162_v59  ;;  %v787_v44 = vpop.f32.mrb[13].mxu1  ;;  %v849_v48 = vsel %vm817_vm13, %v783_v35, %v833_v39 }
 0x1e2   : > { %v788_v45 = vadd.f32 %v2162_v59, %v787_v44  ;;  %v848_v46 = vsel %vm816_vm14, %v778_v38, %v832_v41 }
 0x1e3   : > { %v835_v47 = vmul.f32 0.2, %v793_v43  ;;  %1637 = vmatprep.mubr.msk.f32.mxu0 %vm869_vm4, %v848_v46  ;;  %vm819_vm15 = vcmp.gt.f32.partialorder %v793_v43, 0.0 }
 0x1e4   : > { %vm818_vm0 = vcmp.gt.f32.partialorder %v788_v45, 0.0  ;;  %v834_v49 = vmul.f32 0.2, %v788_v45  ;;  %v1605_v50 = vpop.f32.mrb[14].mxu1  ;;  %1638 = vmatmul.mubr.msk.f32.gmra.mrb[26].mxu0 %vm869_vm4, %v849_v48 }
 0x1e5   : > { %v803_v51 = vadd.f32 %v1605_v50, %v2162_v59  ;;  %v797_v52 = vpop.f32.mrb[15].mxu1  ;;  %v851_v56 = vsel %vm819_vm15, %v793_v43, %v835_v47 }
 0x1e6   : > { %v798_v53 = vadd.f32 %v2162_v59, %v797_v52  ;;  %v850_v54 = vsel %vm818_vm0, %v788_v45, %v834_v49  ;;  %v1125_v59 = vld [vmem:[%s2324_s7 + $0x70] sm:$0xff] }
 0x1e7   : > { %v837_v55 = vmul.f32 0.2, %v803_v51  ;;  %1640 = vmatprep.mubr.msk.f32.mxu0 %vm869_vm4, %v850_v54  ;;  %vm821_vm1 = vcmp.gt.f32.partialorder %v803_v51, 0.0  ;;  %v1758_v62 = vpack.c.bf16 %v1126_v61, %v1125_v59 }
 0x1e8   : > { %vm820_vm2 = vcmp.gt.f32.partialorder %v798_v53, 0.0  ;;  %v836_v57 = vmul.f32 0.2, %v798_v53  ;;  %1641 = vmatmul.mubr.msk.f32.gmra.mrb[28].mxu0 %vm869_vm4, %v851_v56 }
 0x1e9   : > { %v853_v60 = vsel %vm821_vm1, %v803_v51, %v837_v55  ;;  %1759 = vmatprep.subr.bf16.mxu1 %v1758_v62 }
 0x1ea   : > { %v852_v58 = vsel %vm820_vm2, %v798_v53, %v836_v57  ;;  %1761 = vmatpush3.bf16.msra.mxu1 %v1758_v62 }
 0x1eb   : > { %1643 = vmatprep.mubr.msk.f32.mxu0 %vm869_vm4, %v852_v58 }
 0x1ec   : > { %1644 = vmatmul.mubr.msk.f32.gmra.mrb[30].mxu0 %vm869_vm4, %v853_v60 }
 0x2a3   : > { %v1624_v0 = vpop.f32.mrb[16].mxu0 }
 0x2a4   : > { %v990_v1 = vadd.f32 %v1624_v0, %v2205_v63  ;;  %v984_v2 = vpop.f32.mrb[17].mxu0 }
 0x2a5   : > { %v985_v3 = vadd.f32 %v2205_v63, %v984_v2 }
 0x2a6   : > { %v1080_v4 = vmul.f32 0.2, %v990_v1  ;;  %vm1064_vm3 = vcmp.gt.f32.partialorder %v990_v1, 0.0 }
 0x2a7   : > { %v1079_v5 = vmul.f32 0.2, %v985_v3  ;;  %v1627_v6 = vpop.f32.mrb[18].mxu0  ;;  %vm1063_vm4 = vcmp.gt.f32.partialorder %v985_v3, 0.0 }
 0x2a8   : > { %v1000_v7 = vadd.f32 %v1627_v6, %v2205_v63  ;;  %v994_v8 = vpop.f32.mrb[19].mxu0  ;;  %v1096_v11 = vsel %vm1064_vm3, %v990_v1, %v1080_v4  ;;  %v2226_v1 = vld [vmem:[%s2325_s8] ss:$0 sm:$0xff] }
 0x2a9   : > { %v995_v9 = vadd.f32 %v2205_v63, %v994_v8  ;;  %v1095_v10 = vsel %vm1063_vm4, %v985_v3, %v1079_v5 }
 0x2aa   : > { %v1082_v12 = vmul.f32 0.2, %v1000_v7  ;;  %1678 = vmatprep.mubr.f32.mxu1 %v1095_v10  ;;  %vm1066_vm6 = vcmp.gt.f32.partialorder %v1000_v7, 0.0 }
 0x2ab   : > { %v1081_v13 = vmul.f32 0.2, %v995_v9  ;;  %v1630_v14 = vpop.f32.mrb[20].mxu0  ;;  %1679 = vmatmul.mubr.f32.vlgmr.msra.gmra.mrb[16].mxu1 %v1096_v11  ;;  %vm1065_vm5 = vcmp.gt.f32.partialorder %v995_v9, 0.0 }
 0x2ac   : > { %v1010_v15 = vadd.f32 %v1630_v14, %v2205_v63  ;;  %v1004_v16 = vpop.f32.mrb[21].mxu0  ;;  %v1098_v20 = vsel %vm1066_vm6, %v1000_v7, %v1082_v12 }
 0x2ad   : > { %v1005_v17 = vadd.f32 %v2205_v63, %v1004_v16  ;;  %v1097_v18 = vsel %vm1065_vm5, %v995_v9, %v1081_v13 }
 0x2ae   : > { %v1084_v19 = vmul.f32 0.2, %v1010_v15  ;;  %1681 = vmatprep.mubr.f32.mxu1 %v1097_v18  ;;  %vm1068_vm8 = vcmp.gt.f32.partialorder %v1010_v15, 0.0 }
 0x2af   : > { %v1083_v21 = vmul.f32 0.2, %v1005_v17  ;;  %v1633_v22 = vpop.f32.mrb[22].mxu0  ;;  %1682 = vmatmul.mubr.f32.gmra.mrb[18].mxu1 %v1098_v20  ;;  %vm1067_vm7 = vcmp.gt.f32.partialorder %v1005_v17, 0.0 }
 0x2b0   : > { %v1020_v23 = vadd.f32 %v1633_v22, %v2205_v63  ;;  %v1014_v24 = vpop.f32.mrb[23].mxu0  ;;  %v1100_v28 = vsel %vm1068_vm8, %v1010_v15, %v1084_v19 }
 0x2b1   : > { %v1015_v25 = vadd.f32 %v2205_v63, %v1014_v24  ;;  %v1099_v26 = vsel %vm1067_vm7, %v1005_v17, %v1083_v21 }
 0x2b2   : > { %v1086_v27 = vmul.f32 0.2, %v1020_v23  ;;  %1684 = vmatprep.mubr.f32.mxu1 %v1099_v26  ;;  %vm1070_vm10 = vcmp.gt.f32.partialorder %v1020_v23, 0.0 }
 0x2b3   : > { %v1085_v29 = vmul.f32 0.2, %v1015_v25  ;;  %v1636_v30 = vpop.f32.mrb[24].mxu0  ;;  %1685 = vmatmul.mubr.f32.gmra.mrb[20].mxu1 %v1100_v28  ;;  %vm1069_vm9 = vcmp.gt.f32.partialorder %v1015_v25, 0.0 }
 0x2b4   : > { %v1030_v31 = vadd.f32 %v1636_v30, %v2205_v63  ;;  %v1024_v32 = vpop.f32.mrb[25].mxu0  ;;  %v1102_v36 = vsel %vm1070_vm10, %v1020_v23, %v1086_v27 }
 0x2b5   : > { %v1025_v33 = vadd.f32 %v2205_v63, %v1024_v32  ;;  %v1101_v34 = vsel %vm1069_vm9, %v1015_v25, %v1085_v29 }
 0x2b6   : > { %v1088_v35 = vmul.f32 0.2, %v1030_v31  ;;  %1687 = vmatprep.mubr.f32.mxu1 %v1101_v34  ;;  %vm1072_vm12 = vcmp.gt.f32.partialorder %v1030_v31, 0.0 }
 0x2b7   : > { %v1087_v38 = vmul.f32 0.2, %v1025_v33  ;;  %v1639_v37 = vpop.f32.mrb[26].mxu0  ;;  %1688 = vmatmul.mubr.f32.gmra.mrb[22].mxu1 %v1102_v36  ;;  %vm1071_vm11 = vcmp.gt.f32.partialorder %v1025_v33, 0.0 }
 0x2b8   : > { %v1040_v39 = vadd.f32 %v1639_v37, %v2205_v63  ;;  %v1034_v40 = vpop.f32.mrb[27].mxu0  ;;  %v1104_v44 = vsel %vm1072_vm12, %v1030_v31, %v1088_v35 }
 0x2b9   : > { %v1035_v41 = vadd.f32 %v2205_v63, %v1034_v40  ;;  %v1103_v42 = vsel %vm1071_vm11, %v1025_v33, %v1087_v38 }
 0x2ba   : > { %v1090_v43 = vmul.f32 0.2, %v1040_v39  ;;  %1690 = vmatprep.mubr.f32.mxu1 %v1103_v42  ;;  %vm1074_vm14 = vcmp.gt.f32.partialorder %v1040_v39, 0.0 }
 0x2bb   : > { %v1089_v45 = vmul.f32 0.2, %v1035_v41  ;;  %v1642_v46 = vpop.f32.mrb[28].mxu0  ;;  %1691 = vmatmul.mubr.f32.gmra.mrb[24].mxu1 %v1104_v44  ;;  %vm1073_vm13 = vcmp.gt.f32.partialorder %v1035_v41, 0.0 }
 0x2bc   : > { %v1050_v47 = vadd.f32 %v1642_v46, %v2205_v63  ;;  %v1044_v48 = vpop.f32.mrb[29].mxu0  ;;  %v1106_v52 = vsel %vm1074_vm14, %v1040_v39, %v1090_v43 }
 0x2bd   : > { %v1045_v49 = vadd.f32 %v2205_v63, %v1044_v48  ;;  %v1105_v50 = vsel %vm1073_vm13, %v1035_v41, %v1089_v45 }
 0x2be   : > { %v1092_v51 = vmul.f32 0.2, %v1050_v47  ;;  %1693 = vmatprep.mubr.f32.mxu1 %v1105_v50  ;;  %vm1076_vm0 = vcmp.gt.f32.partialorder %v1050_v47, 0.0 }
 0x2bf   : > { %v1091_v53 = vmul.f32 0.2, %v1045_v49  ;;  %v1645_v54 = vpop.f32.mrb[30].mxu0  ;;  %1694 = vmatmul.mubr.f32.gmra.mrb[26].mxu1 %v1106_v52  ;;  %vm1075_vm15 = vcmp.gt.f32.partialorder %v1045_v49, 0.0 }
 0x2c0   : > { %v1060_v55 = vadd.f32 %v1645_v54, %v2205_v63  ;;  %v1054_v56 = vpop.f32.mrb[31].mxu0  ;;  %v1108_v59 = vsel %vm1076_vm0, %v1050_v47, %v1092_v51 }
 0x2c1   : > { %v1055_v57 = vadd.f32 %v2205_v63, %v1054_v56  ;;  %v1107_v58 = vsel %vm1075_vm15, %v1045_v49, %v1091_v53 }
 0x2c2   : > { %v1094_v60 = vmul.f32 0.2, %v1060_v55  ;;  %1696 = vmatprep.mubr.f32.mxu1 %v1107_v58  ;;  %vm1078_vm2 = vcmp.gt.f32.partialorder %v1060_v55, 0.0 }
 0x2c3   : > { %v1093_v61 = vmul.f32 0.2, %v1055_v57  ;;  %1697 = vmatmul.mubr.f32.gmra.mrb[28].mxu1 %v1108_v59  ;;  %vm1077_vm1 = vcmp.gt.f32.partialorder %v1055_v57, 0.0 }
 0x2c4   : > { %v1110_v0 = vsel %vm1078_vm2, %v1060_v55, %v1094_v60 }
 0x2c5   : > { %v1109_v62 = vsel %vm1077_vm1, %v1055_v57, %v1093_v61 }
 0x2c6   : > { %1699 = vmatprep.mubr.f32.mxu1 %v1109_v62 }
 0x2c7   : > { %1700 = vmatmul.mubr.f32.gmra.mrb[30].mxu1 %v1110_v0 }
 0x37e   : > { %v1680_v63 = vpop.f32.mrb[16].mxu1 }
 0x37f   : > { %v1206_v2 = vadd.f32 %v1680_v63, %v2226_v1  ;;  %v1200_v3 = vpop.f32.mrb[17].mxu1 }
 0x380   : > { %v1201_v4 = vadd.f32 %v2226_v1, %v1200_v3 }
 0x381   : > { %1803 = vtanh.f32 %v1206_v2 }
 0x382   : > { %1805 = vtanh.f32 %v1201_v4  ;;  %v1683_v5 = vpop.f32.mrb[18].mxu1 }
 0x383   : > { %v1216_v6 = vadd.f32 %v1683_v5, %v2226_v1  ;;  %v1210_v7 = vpop.f32.mrb[19].mxu1 }
 0x384   : > { %v1211_v8 = vadd.f32 %v2226_v1, %v1210_v7 }
 0x385   : > { %1807 = vtanh.f32 %v1216_v6 }
 0x386   : > { %1809 = vtanh.f32 %v1211_v8  ;;  %v1686_v9 = vpop.f32.mrb[20].mxu1 }
 0x387   : > { %v1226_v10 = vadd.f32 %v1686_v9, %v2226_v1  ;;  %v1220_v11 = vpop.f32.mrb[21].mxu1 }
 0x388   : > { %v1221_v12 = vadd.f32 %v2226_v1, %v1220_v11 }
 0x389   : > { %1811 = vtanh.f32 %v1226_v10 }
 0x38a   : > { %1813 = vtanh.f32 %v1221_v12  ;;  %v1689_v13 = vpop.f32.mrb[22].mxu1 }
 0x38b   : > { %v1804_v14 = vpop.eup %1803  ;;  %v1236_v15 = vadd.f32 %v1689_v13, %v2226_v1  ;;  %v1230_v16 = vpop.f32.mrb[23].mxu1 }
 0x38c   : > { %v1806_v17 = vpop.eup %1805  ;;  %1296 = vst [vmem:[%s2238_s24 + $0x8] sm:$0xff] %v1804_v14  ;;  %v1231_v18 = vadd.f32 %v2226_v1, %v1230_v16 }
 0x38d   : > { %1295 = vst [vmem:[%s2238_s24] sm:$0xff] %v1806_v17  ;;  %1815 = vtanh.f32 %v1236_v15 }
 0x38e   : > { %1817 = vtanh.f32 %v1231_v18  ;;  %v1692_v19 = vpop.f32.mrb[24].mxu1 }
 0x38f   : > { %v1808_v20 = vpop.eup %1807  ;;  %v1246_v21 = vadd.f32 %v1692_v19, %v2226_v1  ;;  %v1240_v22 = vpop.f32.mrb[25].mxu1 }
 0x390   : > { %v1810_v23 = vpop.eup %1809  ;;  %1298 = vst [vmem:[%s2238_s24 + $0x18] sm:$0xff] %v1808_v20  ;;  %v1241_v24 = vadd.f32 %v2226_v1, %v1240_v22 }
 0x391   : > { %1297 = vst [vmem:[%s2238_s24 + $0x10] sm:$0xff] %v1810_v23  ;;  %1819 = vtanh.f32 %v1246_v21 }
 0x392   : > { %1821 = vtanh.f32 %v1241_v24  ;;  %v1695_v25 = vpop.f32.mrb[26].mxu1 }
 0x393   : > { %v1812_v26 = vpop.eup %1811  ;;  %v1256_v27 = vadd.f32 %v1695_v25, %v2226_v1  ;;  %v1250_v28 = vpop.f32.mrb[27].mxu1 }
 0x394   : > { %v1814_v29 = vpop.eup %1813  ;;  %1300 = vst [vmem:[%s2238_s24 + $0x28] sm:$0xff] %v1812_v26  ;;  %v1251_v30 = vadd.f32 %v2226_v1, %v1250_v28 }
 0x395   : > { %1299 = vst [vmem:[%s2238_s24 + $0x20] sm:$0xff] %v1814_v29  ;;  %1823 = vtanh.f32 %v1256_v27 }
 0x396   : > { %1825 = vtanh.f32 %v1251_v30  ;;  %v1698_v31 = vpop.f32.mrb[28].mxu1 }
 0x397   : > { %v1816_v32 = vpop.eup %1815  ;;  %v1266_v33 = vadd.f32 %v1698_v31, %v2226_v1  ;;  %v1260_v34 = vpop.f32.mrb[29].mxu1 }
 0x398   : > { %v1818_v35 = vpop.eup %1817  ;;  %1302 = vst [vmem:[%s2238_s24 + $0x38] sm:$0xff] %v1816_v32  ;;  %v1261_v36 = vadd.f32 %v2226_v1, %v1260_v34 }
 0x399   : > { %1301 = vst [vmem:[%s2238_s24 + $0x30] sm:$0xff] %v1818_v35  ;;  %1827 = vtanh.f32 %v1266_v33 }
 0x39a   : > { %1829 = vtanh.f32 %v1261_v36  ;;  %v1701_v38 = vpop.f32.mrb[30].mxu1 }
 0x39b   : > { %v1820_v37 = vpop.eup %1819  ;;  %v1276_v39 = vadd.f32 %v1701_v38, %v2226_v1  ;;  %v1270_v40 = vpop.f32.mrb[31].mxu1 }
 0x39c   : > { %v1822_v41 = vpop.eup %1821  ;;  %1304 = vst [vmem:[%s2238_s24 + $0x48] sm:$0xff] %v1820_v37  ;;  %v1271_v42 = vadd.f32 %v2226_v1, %v1270_v40 }
 0x39d   : > { %1303 = vst [vmem:[%s2238_s24 + $0x40] sm:$0xff] %v1822_v41  ;;  %1831 = vtanh.f32 %v1276_v39 }
 0x39e   : > { %1833 = vtanh.f32 %v1271_v42 }
 0x39f   : > { %v1824_v43 = vpop.eup %1823 }
 0x3a0   : > { %v1826_v44 = vpop.eup %1825  ;;  %1306 = vst [vmem:[%s2238_s24 + $0x58] sm:$0xff] %v1824_v43 }
 0x3a1   : > { %1305 = vst [vmem:[%s2238_s24 + $0x50] sm:$0xff] %v1826_v44 }
 0x3a3   : > { %v1828_v45 = vpop.eup %1827 }
 0x3a4   : > { %v1830_v46 = vpop.eup %1829  ;;  %1308 = vst [vmem:[%s2238_s24 + $0x68] sm:$0xff] %v1828_v45 }
 0x3a5   : > { %1307 = vst [vmem:[%s2238_s24 + $0x60] sm:$0xff] %v1830_v46 }
 0x3a7   : > { %v1832_v47 = vpop.eup %1831 }
 0x3a8   : > { %v1834_v48 = vpop.eup %1833  ;;  %1310 = vst [vmem:[%s2238_s24 + $0x78] sm:$0xff] %v1832_v47 }
 0x3a9   : > { %1309 = vst [vmem:[%s2238_s24 + $0x70] sm:$0xff] %v1834_v48 }
 0x3aa   : > { %1848 = shalt.err (!%p1845_p3)
}
 0x3ab   : > { %s1849_s22 = scalar_lea.hbm %s2268_s29, 2048  ;;  %s1853_s25 = scalar_lea.hbm %s2326_s9, 4096 }
 0x3ac   : > { %p1850_p4 = scmp.ne.s32.totalorder %s2268_s29, %s1849_s22  ;;  %p1854_p9 = scmp.lt.u32.totalorder %s2268_s29, %s2326_s9 }
 0x3ad   : > { %p1855_p10 = scmp.lt.u32.totalorder %s1853_s25, %s1849_s22  ;;  %p1857_p12 = scmp.lt.u32.totalorder %s1849_s22, %s2268_s29 }
 0x3ae   : > { %p1851_p7 = pnand %p1850_p4, %p1990_p5 }
 0x3af   : > { %p1856_p11 = por %p1855_p10, %p1854_p9 }
 0x3b0   : > { %p1852_p8 = pneg %p1851_p7 }
 0x3b1   : > { %p1858_p13 = por %p1857_p12, %p1856_p11 }
 0x3b3   : > { %p1859_p0 = pnand %p1858_p13, %p1852_p8 }
 0x3b5   : > { %1862 = shalt.err (!%p1859_p0)
}
 0x3b6   : > { %s1900_s14 = smov 128   ;;  %s1901_s16 = smov 8  }
 0x3b7   : > { %1762 = dma.vmem_to_hbm [thread:$0]  (%p1990_p5), %s2270_s26, 2048, %s2268_s29, %s2276_s13, %s1900_s14, %s1900_s14, %s1901_s16  }
 0x3b8 PF: > { %p1768_p1 = scmp.ge.s32.totalorder %s1897_s12, 2  ;;  %s1340_s17 = sand.u32 1, %s1885_s30  }
 0x3b9   : > { %s1341_s21 = scalar_lea.sflag [#allocation3], %s1340_s17 }
 0x3ba   : > { %p1765_p2 = pnand %p1768_p1, %p1994_p6 }
 0x3bc   : > { %1880 = dma.done.wait (!%p1765_p2), %s1341_s21, 2048  }
 0x3bd   : > { %1882 = vsyncadd (!%p1765_p2), %s1341_s21, 4294965248  ;;  %p19_p3 = scmp.ge.s32.totalorder %s1977_s15, 4   ;;  %s2329_s30 = smov %s1889_s10 }
 0x3be   : > { %s2330_s10 = smov %s1893_s11  ;;  %s2331_s11 = smov %s1988_s18 }
 0x3bf   : > { %s2332_s12 = smov %s1977_s15  ;;  %21 = sbr.rel (!%p19_p3) target bundleno = 3 (0x3), region = 91 }
 0x3c6   :  { %1346 = vsyncpa [#allocation3], 1 }
 0x3c7   :  { %1348 = vsyncpa [#allocation3 + $0x1], 1 }

</bundles_post_ra>
